<compile_context>
chip_gen: v6e
topology: v6e:2x2x1
jax: 0.10.0
libtpu: 0.0.40
codegen_flags: <defaults>
</compile_context>

<pallas_src>
import jax
import jax.numpy as jnp
from jax.experimental import pallas as pl
from jax.experimental.pallas import tpu as pltpu

_SQRT_2_OVER_PI = 0.7978845608028654  # sqrt(2/pi)
_GELU_K = 0.044715


def _make_gelu_kernel(compute_dtype):
    cd = compute_dtype

    def kernel(x_ref, o_ref):
        x = x_ref[...].astype(cd)
        c = jnp.asarray(_SQRT_2_OVER_PI, cd)
        k = jnp.asarray(_GELU_K, cd)
        half = jnp.asarray(0.5, cd)
        one = jnp.asarray(1.0, cd)
        # inner = c * x * (1 + k*x*x); y = 0.5 * x * (1 + tanh(inner))
        inner = c * x * (one + k * (x * x))
        y = half * x * (one + jnp.tanh(inner))
        o_ref[...] = y.astype(o_ref.dtype)

    return kernel


def _sublane_multiple(dtype):
    # f32 -> 8 sublanes, bf16/f16 -> 16, int8/fp8 -> 32
    return max(8, 32 // jnp.dtype(dtype).itemsize)


def gelu_pallas(x, *, row_tile=None, target_block_bytes=2 << 20, compute_dtype=None):
    """Tanh-GELU applied elementwise, matching the PyTorch module semantics."""
    orig_shape = x.shape
    dtype = x.dtype
    itemsize = jnp.dtype(dtype).itemsize
    total = x.size

    if compute_dtype is None:
        compute_dtype = jnp.float32
        if dtype == jnp.bfloat16:
            # v6e/v7x VPU+EUP handle bf16 natively (halves vreg pressure,
            # doubles EUP tanh throughput); keep the f32 upcast on v5e.
            try:
                kind = jax.devices()[0].device_kind.lower()
            except Exception:
                kind = ""
            if "v5" not in kind:
                compute_dtype = jnp.bfloat16

    # --- lane-dense 2D slab -------------------------------------------------
    LANE = 128
    width = None
    if total % LANE == 0:
        for cand in (1024, 512, 256, 128):
            if total % cand == 0:
                width = cand
                break
    if width is None:
        # Fallback: keep the original hidden dim as the lane axis (full-extent
        # last-dim block is always legal, though it may use masked stores).
        width = orig_shape[-1]
    x2d = x.reshape(-1, width)
    rows = x2d.shape[0]

    # --- row-tile selection ---------------------------------------------------
    sub = _sublane_multiple(dtype)
    if row_tile is None:
        # ~2 MiB per block: 2 bufs x (in + out) ~ 8 MiB, fits every generation's
        # scoped-VMEM default while giving DMA/compute overlap many grid steps.
        row_tile = max(sub, (target_block_bytes // (width * itemsize)) // sub * sub)
    if row_tile >= rows:
        row_tile = rows  # single full-extent block (always a legal block shape)
    else:
        row_tile = max(sub, (row_tile // sub) * sub)

    num_tiles = pl.cdiv(rows, row_tile)
    padded_rows = num_tiles * row_tile
    if padded_rows != rows:
        x2d = jnp.pad(x2d, ((0, padded_rows - rows), (0, 0)))

    out2d = pl.pallas_call(
        _make_gelu_kernel(compute_dtype),
        out_shape=jax.ShapeDtypeStruct((padded_rows, width), dtype),
        grid_spec=pltpu.PrefetchScalarGridSpec(
            num_scalar_prefetch=0,
            grid=(num_tiles,),
            in_specs=[pl.BlockSpec((row_tile, width), lambda i: (i, 0))],
            out_specs=pl.BlockSpec((row_tile, width), lambda i: (i, 0)),
        ),
        compiler_params=pltpu.CompilerParams(
            dimension_semantics=("parallel",),
        ),
    )(x2d)

    if padded_rows != rows:
        out2d = out2d[:rows]
    return out2d.reshape(orig_shape)


def gelu_ref(x):
    xf = x.astype(jnp.float32)
    c = jnp.sqrt(jnp.float32(2.0) / jnp.pi)
    return (0.5 * xf * (1.0 + jnp.tanh(c * (xf + 0.044715 * xf ** 3)))).astype(x.dtype)


if __name__ == "__main__":
    key = jax.random.PRNGKey(0)
    batch, seq, hidden = 2, 8, 32
    x = jax.random.normal(key, (batch, seq, hidden), dtype=jnp.float32)

    out = gelu_pallas(x)
    jax.block_until_ready(out)

    ref = gelu_ref(x)
    assert out.shape == x.shape and out.dtype == x.dtype
    assert jnp.allclose(out, ref, atol=1e-5, rtol=1e-5)

    # Exercise the ragged / multi-tile path (padding + grid > 1).
    x2 = jax.random.normal(jax.random.PRNGKey(1), (3, 7, 160), dtype=jnp.float32)
    out2 = gelu_pallas(x2, row_tile=8)
    jax.block_until_ready(out2)
    assert out2.shape == x2.shape and out2.dtype == x2.dtype
    assert jnp.allclose(out2, gelu_ref(x2), atol=1e-5, rtol=1e-5)

    print("KERNEL_OK")
</pallas_src>

<mosaic_0001>
module attributes {stable_mosaic.version = 11 : i64} {
  func.func @kernel(%arg0: i32, %arg1: memref<1x512xf32, #tpu.memory_space<vmem>>, %arg2: memref<1x512xf32, #tpu.memory_space<vmem>>) attributes {dimension_semantics = [#tpu.dimension_semantics<parallel>], iteration_bounds = array<i64: 1>, scalar_prefetch = 0 : i64, scratch_operands = 0 : i64, tpu.core_type = #tpu.core_type<tc>, window_params = [{transform_indices = @transform_0, window_bounds = array<i64: 1, 512>}, {transform_indices = @transform_1, window_bounds = array<i64: 1, 512>}]} {
    %c0 = arith.constant 0 : index
    %c0_0 = arith.constant 0 : index
    %0 = vector.load %arg1[%c0, %c0_0] : memref<1x512xf32, #tpu.memory_space<vmem>>, vector<1x512xf32>
    %cst = arith.constant 0.797884583 : f32
    %1 = vector.broadcast %cst : f32 to vector<1x512xf32>
    %2 = arith.mulf %1, %0 : vector<1x512xf32>
    %3 = arith.mulf %0, %0 : vector<1x512xf32>
    %cst_1 = arith.constant 4.471500e-02 : f32
    %4 = vector.broadcast %cst_1 : f32 to vector<1x512xf32>
    %5 = arith.mulf %4, %3 : vector<1x512xf32>
    %cst_2 = arith.constant 1.000000e+00 : f32
    %6 = vector.broadcast %cst_2 : f32 to vector<1x512xf32>
    %7 = arith.addf %6, %5 : vector<1x512xf32>
    %8 = arith.mulf %2, %7 : vector<1x512xf32>
    %cst_3 = arith.constant 5.000000e-01 : f32
    %9 = vector.broadcast %cst_3 : f32 to vector<1x512xf32>
    %10 = arith.mulf %9, %0 : vector<1x512xf32>
    %11 = math.tanh %8 : vector<1x512xf32>
    %cst_4 = arith.constant 1.000000e+00 : f32
    %12 = vector.broadcast %cst_4 : f32 to vector<1x512xf32>
    %13 = arith.addf %12, %11 : vector<1x512xf32>
    %14 = arith.mulf %10, %13 : vector<1x512xf32>
    %c0_5 = arith.constant 0 : index
    %c0_6 = arith.constant 0 : index
    %15 = vector.load %arg2[%c0_5, %c0_6] : memref<1x512xf32, #tpu.memory_space<vmem>>, vector<1x512xf32>
    tpu.vector_store %arg2[%c0_5, %c0_6], %14 {strides = array<i32>} : memref<1x512xf32, #tpu.memory_space<vmem>>, vector<1x512xf32>,
    return
  }
  func.func @transform_0(%arg0: i32) -> (i32, i32) {
    %c0_i32 = arith.constant 0 : i32
    %c0_i32_0 = arith.constant 0 : i32
    return %arg0, %c0_i32 : i32, i32
  }
  func.func @transform_1(%arg0: i32) -> (i32, i32) {
    %c0_i32 = arith.constant 0 : i32
    %c0_i32_0 = arith.constant 0 : i32
    return %arg0, %c0_i32 : i32, i32
  }
}

</mosaic_0001>

<bundles_post_ra>
// kernel: tpu_custom_call.1
= control target key start
LH: loop header
LB: loop body
LE: loop exit
PB: predicated region body
PF: predicated region fallthrough
CT: control target
= control target key end

     0   :  { %6 = vsyncpa [#allocation3], 0  ;;  %s117_s0 = inlined_call_operand.hbm [shape: f32[1,512], index: 0, kind: input, shape index: {}]   ;;  %s118_s1 = inlined_call_operand.hbm [shape: f32[1,512], index: 1, kind: output, shape index: {}]  }
   0x1   :  { %7 = vsyncpa [#allocation4], 0  ;;  %s99_s6 = smov [#allocation2]  }
   0x2   :  { %s14_s7 = sshll.u32 %s99_s6, 4  ;;  %s15_s7 = int_to_ptr.vmem [resolvable:$true] %s14_s7 }
   0x3   :  { %s63_s8 = scalar_lea.vmem %s15_s7, 64  ;;  %p68_p1 = scmp.lt.s32.totalorder %s15_s7, %s15_s7 }
   0x4   :  { %p64_p0 = scmp.ne.s32.totalorder %s15_s7, %s63_s8  ;;  %p69_p2 = scmp.lt.s32.totalorder %s63_s8, %s63_s8 }
   0x6   :  { %p70_p3 = por %p69_p2, %p68_p1 }
   0x8   :  { %p71_p4 = pnand %p70_p3, %p64_p0 }
   0xa   :  { %74 = shalt.err (!%p71_p4)
}
   0xb   :  { %17 = dma.hbm_to_vmem [thread:$0]  %s117_s0, 64, %s15_s7, [#allocation3]  }
   0xc   :  { %95 = dma.done.wait [#allocation3], 64  }
   0xd   :  { %96 = vsyncadd [#allocation3], 4294967232  ;;  %v21_v0 = vld [vmem:[#allocation2] sm:$0xf]  ;;  %v31_v6 = vlaneseq  ;;  %s100_s11 = smov [#allocation5]  }
   0xe   :  { %v23_v1 = vmul.f32 %v21_v0, %v21_v0  ;;  %v22_v2 = vmul.f32 0.7978846, %v21_v0  ;;  %v27_v7 = vmul.f32 0.5, %v21_v0  ;;  %s42_s12 = sshll.u32 %s100_s11, 4  ;;  %s43_s12 = int_to_ptr.vmem [resolvable:$true] %s42_s12 }
   0xf   :  { %vm33_vm0 = vcmp.lt.s32.totalorder %v31_v6, 512  ;;  %s75_s0 = scalar_lea.vmem %s43_s12, 64  ;;  %p80_p6 = scmp.lt.s32.totalorder %s43_s12, %s43_s12 }
  0x10   :  { %v24_v3 = vmul.f32 0.044715, %v23_v1  ;;  %p76_p5 = scmp.ne.s32.totalorder %s43_s12, %s75_s0  ;;  %p81_p7 = scmp.lt.s32.totalorder %s75_s0, %s75_s0 }
  0x12   :  { %v25_v4 = vadd.f32 1.0, %v24_v3  ;;  %p82_p8 = por %p81_p7, %p80_p6 }
  0x14   :  { %v26_v5 = vmul.f32 %v25_v4, %v22_v2  ;;  %p83_p9 = pnand %p82_p8, %p76_p5 }
  0x16   :  { %53 = vtanh.f32 %v26_v5 }
  0x23   :  { %v54_v8 = vpop.eup %53 }
  0x24   :  { %v29_v9 = vadd.f32 1.0, %v54_v8 }
  0x26   :  { %v30_v10 = vmul.f32 %v29_v9, %v27_v7 }
  0x28   :  { %35 = vst.msk [vmem:[#allocation5] sm:$0xf] %vm33_vm0, %v30_v10 }
  0x29   :  { %86 = shalt.err (!%p83_p9)
}
  0x2a   :  { %45 = dma.vmem_to_hbm [thread:$0]  %s43_s12, 64, %s118_s1, [#allocation4]  }
  0x2b   :  { %97 = dma.done.wait [#allocation4], 64  }
  0x2c   :  { %98 = vsyncadd [#allocation4], 4294967232 }
  0x2d   :  { %49 = vsyncpa [#allocation3], 1 }
  0x2e   :  { %50 = vsyncpa [#allocation4], 1 }

</bundles_post_ra>
